<compile_context>
chip_gen: v7x
topology: tpu7x:2x2x1
jax: 0.10.0
libtpu: 0.0.40
codegen_flags: <defaults>
</compile_context>

<pallas_src>
import functools

import jax
import jax.numpy as jnp
from jax.experimental import pallas as pl
from jax.experimental.pallas import tpu as pltpu


def _round_up(a, b):
    return (a + b - 1) // b * b


def _pred_layer_kernel(x_ref, w_ref, b_ref, y_ref, *refs, with_scores):
    # x_ref:   (TN, D)  bf16  row tile of activations (resident across V axis)
    # w_ref:   (D, TV)  bf16  vocab tile of the pre-transposed Linear weight
    # b_ref:   (1, TV)  f32   vocab tile of the bias (-1e30 in padded columns)
    # y_ref:   (TN, 1)  i32   target ids for the row tile
    # scores_ref (optional): (TN, TV) raw logits tile
    # nll_ref: (TN, 1)  f32   per-row NLL, written at the last V step
    # m_sc/l_sc/tgt_sc: (TN, 1) f32 VMEM scratch (running max / sum(exp) / tgt logit)
    if with_scores:
        scores_ref, nll_ref, m_sc, l_sc, tgt_sc = refs
    else:
        nll_ref, m_sc, l_sc, tgt_sc = refs

    v = pl.program_id(1)

    @pl.when(v == 0)
    def _():
        m_sc[...] = jnp.full_like(m_sc, -jnp.inf)
        l_sc[...] = jnp.zeros_like(l_sc)
        tgt_sc[...] = jnp.zeros_like(tgt_sc)

    # MXU-native (M,K)x(K,N) matmul: bf16 inputs, f32 accumulation.
    logits = jnp.dot(x_ref[...], w_ref[...],
                     preferred_element_type=jnp.float32) + b_ref[...]
    if with_scores:
        scores_ref[...] = logits.astype(scores_ref.dtype)

    # Online (flash-style) logsumexp across vocab tiles.
    m_prev = m_sc[...]
    m_new = jnp.maximum(m_prev, jnp.max(logits, axis=-1, keepdims=True))
    alpha = jnp.exp(m_prev - m_new)
    # TODO(synk): on v6e/v7x the exp could run in bf16 (f32 accumulate) for
    # ~2x EUP throughput; kept in f32 so the same kernel is safe on v5e.
    l_sc[...] = alpha * l_sc[...] + jnp.sum(jnp.exp(logits - m_new),
                                            axis=-1, keepdims=True)
    m_sc[...] = m_new

    # Target-logit gather via masked sum: shift the target instead of the iota
    # ((tn,1) subtract instead of a (tn,tv) int add every step).
    tv = logits.shape[1]
    y_local = y_ref[...] - v * tv                       # (tn, 1) i32
    col = jax.lax.broadcasted_iota(jnp.int32, logits.shape, 1)
    tgt_sc[...] += jnp.sum(jnp.where(col == y_local, logits, 0.0),
                           axis=-1, keepdims=True)

    @pl.when(v == pl.num_programs(1) - 1)
    def _():
        nll_ref[...] = m_sc[...] + jnp.log(l_sc[...]) - tgt_sc[...]


def pred_layer_forward(x, weight, bias, y, *, tile_n=512, tile_v=512,
                       scores_dtype=jnp.float32, return_scores=True):
    """PredLayer (asm=False) forward: returns (scores, loss).

    x:      (N, D) float32 activations (tokens x emb_dim)
    weight: (V, D) float32 nn.Linear weight (native layout, NOT transposed)
    bias:   (V,)   float32 nn.Linear bias
    y:      (N,)   int     target indices
    """
    N, D = x.shape
    V, Dw = weight.shape
    assert Dw == D and bias.shape == (V,) and y.shape == (N,)

    # NOTE: the PyTorch module asserts (y == pad_index).sum() == 0 on the host;
    # that forces a device->host sync every call, so it is dropped here.

    # Tile sizes: rows aligned to 16 (bf16 sublane packing), vocab to 128.
    tn = _round_up(min(tile_n, _round_up(N, 16)), 16)
    tv = _round_up(min(tile_v, _round_up(V, 128)), 128)
    n_pad = _round_up(N, tn)
    v_pad = _round_up(V, tv)
    # NOTE(v7x): for megacore sharding of the "parallel" N axis, prefer
    # tile_n such that n_pad // tn >= 2 when N is large.

    # One-time wrapper-side prep: bf16 cast for x, fused transpose+cast for
    # the weight (so the kernel re-streams half the bytes and never transposes).
    x_b = x.astype(jnp.bfloat16)
    w_t = weight.T.astype(jnp.bfloat16)                 # (D, V) bf16
    b_p = bias.astype(jnp.float32)
    y_p = y.astype(jnp.int32)
    if n_pad != N:
        x_b = jnp.pad(x_b, ((0, n_pad - N), (0, 0)))
        y_p = jnp.pad(y_p, (0, n_pad - N))
    if v_pad != V:
        w_t = jnp.pad(w_t, ((0, 0), (0, v_pad - V)))
        # Padded vocab columns get a hugely negative bias so they never
        # influence the max / logsumexp. Since v_pad - V < tv, every vocab
        # tile still contains at least one real column.
        b_p = jnp.pad(b_p, (0, v_pad - V), constant_values=-1e30)

    grid = (n_pad // tn, v_pad // tv)
    scores_item = jnp.dtype(scores_dtype).itemsize if return_scores else 0

    # VMEM budget: double-buffered bf16 x/W tiles + bias/y + output tiles +
    # f32 logits temporary + accumulators. Capped at 64 MiB (v7x physical).
    vmem_est = (2 * tn * D * 2 + 2 * D * tv * 2 + 2 * tv * 4 + 2 * tn * 4
                + 2 * tn * tv * scores_item + 2 * tn * 4 + 3 * tn * 4
                + tn * tv * 4)
    vmem_limit = int(min(max(2 * vmem_est, 16 << 20), 64 << 20))

    n_row_tiles = n_pad // tn
    cost = pl.CostEstimate(
        flops=2 * n_pad * v_pad * D,
        transcendentals=n_pad * v_pad,
        bytes_accessed=int(n_row_tiles * v_pad * D * 2    # weight, re-streamed
                           + n_pad * D * 2                # x (bf16)
                           + v_pad * 4 + n_pad * 4        # bias + targets
                           + n_pad * v_pad * scores_item  # scores write
                           + n_pad * 4))                  # nll write

    in_specs = [
        pl.BlockSpec((tn, D), lambda n, v: (n, 0)),       # x row tile (bf16)
        # TODO(synk): on v5e consider pipeline_mode=pl.Buffered(3) here if the
        # weight DMA is still exposed.
        pl.BlockSpec((D, tv), lambda n, v: (0, v)),       # weight tile (bf16, (D,V))
        pl.BlockSpec((1, tv), lambda n, v: (0, v)),       # bias tile
        pl.BlockSpec((tn, 1), lambda n, v: (n, 0)),       # targets
    ]
    nll_spec = pl.BlockSpec((tn, 1), lambda n, v: (n, 0))
    if return_scores:
        out_shape = (jax.ShapeDtypeStruct((n_pad, v_pad), scores_dtype),
                     jax.ShapeDtypeStruct((n_pad, 1), jnp.float32))
        out_specs = [pl.BlockSpec((tn, tv), lambda n, v: (n, v)), nll_spec]
    else:
        out_shape = jax.ShapeDtypeStruct((n_pad, 1), jnp.float32)
        out_specs = nll_spec

    result = pl.pallas_call(
        functools.partial(_pred_layer_kernel, with_scores=return_scores),
        out_shape=out_shape,
        grid_spec=pltpu.PrefetchScalarGridSpec(
            num_scalar_prefetch=0,
            grid=grid,
            in_specs=in_specs,
            out_specs=out_specs,
            scratch_shapes=[
                pltpu.VMEM((tn, 1), jnp.float32),  # running max
                pltpu.VMEM((tn, 1), jnp.float32),  # running sum(exp)
                pltpu.VMEM((tn, 1), jnp.float32),  # accumulated target logit
            ],
        ),
        compiler_params=pltpu.CompilerParams(
            # Row tiles independent -> megacore-shardable; vocab axis is the
            # online-softmax reduction axis -> serial.
            dimension_semantics=("parallel", "arbitrary"),
            vmem_limit_bytes=vmem_limit,
        ),
        cost_estimate=cost,
    )(x_b, w_t, b_p.reshape(1, v_pad), y_p.reshape(n_pad, 1))

    if return_scores:
        scores, nll = result
    else:
        scores, nll = None, result

    loss = jnp.sum(nll[:N, 0]) / jnp.float32(N)
    if return_scores and (n_pad != N or v_pad != V):
        scores = scores[:N, :V]
    return scores, loss


def _reference(x, weight, bias, y):
    # Pure-JAX reference of the PyTorch semantics (same bf16 matmul, f32 softmax).
    logits = jnp.dot(x.astype(jnp.bfloat16), weight.astype(jnp.bfloat16).T,
                     preferred_element_type=jnp.float32) + bias
    logp = jax.nn.log_softmax(logits, axis=-1)
    loss = -jnp.mean(logp[jnp.arange(x.shape[0]), y])
    return logits, loss


if __name__ == "__main__":
    key = jax.random.PRNGKey(0)

    # Case 1: toy module config (emb_dim=32, n_words=128, batch*seq=8 tokens).
    # Case 2: non-aligned shapes with small tiles -> exercises multi-tile grid,
    #         padding and masking on both axes.
    cases = [
        dict(N=8, D=32, V=128, tile_n=512, tile_v=512),
        dict(N=20, D=32, V=300, tile_n=16, tile_v=128),
    ]

    for c in cases:
        N, D, V = c["N"], c["D"], c["V"]
        kx, kw, kb, ky, key = jax.random.split(key, 5)
        bound = 1.0 / (D ** 0.5)
        x = jax.random.normal(kx, (N, D), dtype=jnp.float32)
        weight = jax.random.uniform(kw, (V, D), minval=-bound, maxval=bound,
                                    dtype=jnp.float32)
        bias = jax.random.uniform(kb, (V,), minval=-bound, maxval=bound,
                                  dtype=jnp.float32)
        y = jax.random.randint(ky, (N,), 1, V, dtype=jnp.int32)  # avoids pad_index=0

        scores, loss = pred_layer_forward(
            x, weight, bias, y, tile_n=c["tile_n"], tile_v=c["tile_v"])
        jax.block_until_ready((scores, loss))

        ref_scores, ref_loss = _reference(x, weight, bias, y)
        assert scores.shape == (N, V)
        assert jnp.allclose(scores, ref_scores, atol=2e-3, rtol=2e-3), c
        assert jnp.allclose(loss, ref_loss, atol=2e-3, rtol=2e-3), c

        # Loss-only mode (skips the N*V scores write entirely).
        none_scores, loss_only = pred_layer_forward(
            x, weight, bias, y, tile_n=c["tile_n"], tile_v=c["tile_v"],
            return_scores=False)
        jax.block_until_ready(loss_only)
        assert none_scores is None
        assert jnp.allclose(loss_only, ref_loss, atol=2e-3, rtol=2e-3), c

    # bf16 scores output (halves the scores HBM write); looser tolerance.
    N, D, V = 8, 32, 128
    kx, kw, kb, ky, key = jax.random.split(key, 5)
    bound = 1.0 / (D ** 0.5)
    x = jax.random.normal(kx, (N, D), dtype=jnp.float32)
    weight = jax.random.uniform(kw, (V, D), minval=-bound, maxval=bound,
                                dtype=jnp.float32)
    bias = jax.random.uniform(kb, (V,), minval=-bound, maxval=bound,
                              dtype=jnp.float32)
    y = jax.random.randint(ky, (N,), 1, V, dtype=jnp.int32)
    scores_bf16, loss_bf16 = pred_layer_forward(
        x, weight, bias, y, scores_dtype=jnp.bfloat16)
    jax.block_until_ready((scores_bf16, loss_bf16))
    ref_scores, ref_loss = _reference(x, weight, bias, y)
    assert scores_bf16.dtype == jnp.bfloat16
    assert jnp.allclose(scores_bf16.astype(jnp.float32), ref_scores,
                        atol=3e-2, rtol=3e-2)
    assert jnp.allclose(loss_bf16, ref_loss, atol=2e-3, rtol=2e-3)

    print("KERNEL_OK")
</pallas_src>

<mosaic_0001>
module attributes {stable_mosaic.version = 11 : i64} {
  func.func @_pred_layer_kernel(%arg0: i32, %arg1: i32, %arg2: memref<16x32xbf16, #tpu.memory_space<vmem>>, %arg3: memref<32x128xbf16, #tpu.memory_space<vmem>>, %arg4: memref<1x128xf32, #tpu.memory_space<vmem>>, %arg5: memref<16x1xi32, #tpu.memory_space<vmem>>, %arg6: memref<16x128xf32, #tpu.memory_space<vmem>>, %arg7: memref<16x1xf32, #tpu.memory_space<vmem>>, %arg8: memref<16x1xf32, #tpu.memory_space<vmem>>, %arg9: memref<16x1xf32, #tpu.memory_space<vmem>>, %arg10: memref<16x1xf32, #tpu.memory_space<vmem>>) attributes {dimension_semantics = [#tpu.dimension_semantics<parallel>, #tpu.dimension_semantics<arbitrary>], iteration_bounds = array<i64: 1, 1>, scalar_prefetch = 0 : i64, scratch_operands = 3 : i64, tpu.core_type = #tpu.core_type<tc>, window_params = [{transform_indices = @transform_0, window_bounds = array<i64: 16, 32>}, {transform_indices = @transform_1, window_bounds = array<i64: 32, 128>}, {transform_indices = @transform_2, window_bounds = array<i64: 1, 128>}, {transform_indices = @transform_3, window_bounds = array<i64: 16, 1>}, {transform_indices = @transform_4, window_bounds = array<i64: 16, 128>}, {transform_indices = @transform_5, window_bounds = array<i64: 16, 1>}]} {
    %c0_i32 = arith.constant 0 : i32
    %0 = arith.cmpi eq, %arg1, %c0_i32 : i32
    %1 = arith.extui %0 : i1 to i32
    %c0_i32_0 = arith.constant 0 : i32
    %2 = arith.cmpi ne, %1, %c0_i32_0 : i32
    scf.if %2 {
      %cst_28 = arith.constant 0xFF800000 : f32
      %43 = vector.broadcast %cst_28 : f32 to vector<16x1xf32>
      %c0_29 = arith.constant 0 : index
      %c0_30 = arith.constant 0 : index
      %44 = vector.load %arg8[%c0_29, %c0_30] : memref<16x1xf32, #tpu.memory_space<vmem>>, vector<16x1xf32>
      tpu.vector_store %arg8[%c0_29, %c0_30], %43 {strides = array<i32>} : memref<16x1xf32, #tpu.memory_space<vmem>>, vector<16x1xf32>,
      %cst_31 = arith.constant 0.000000e+00 : f32
      %45 = vector.broadcast %cst_31 : f32 to vector<16x1xf32>
      %c0_32 = arith.constant 0 : index
      %c0_33 = arith.constant 0 : index
      %46 = vector.load %arg9[%c0_32, %c0_33] : memref<16x1xf32, #tpu.memory_space<vmem>>, vector<16x1xf32>
      tpu.vector_store %arg9[%c0_32, %c0_33], %45 {strides = array<i32>} : memref<16x1xf32, #tpu.memory_space<vmem>>, vector<16x1xf32>,
      %cst_34 = arith.constant 0.000000e+00 : f32
      %47 = vector.broadcast %cst_34 : f32 to vector<16x1xf32>
      %c0_35 = arith.constant 0 : index
      %c0_36 = arith.constant 0 : index
      %48 = vector.load %arg10[%c0_35, %c0_36] : memref<16x1xf32, #tpu.memory_space<vmem>>, vector<16x1xf32>
      tpu.vector_store %arg10[%c0_35, %c0_36], %47 {strides = array<i32>} : memref<16x1xf32, #tpu.memory_space<vmem>>, vector<16x1xf32>,
    } else {
    }
    %c0 = arith.constant 0 : index
    %c0_1 = arith.constant 0 : index
    %3 = vector.load %arg2[%c0, %c0_1] : memref<16x32xbf16, #tpu.memory_space<vmem>>, vector<16x32xbf16>
    %c0_2 = arith.constant 0 : index
    %c0_3 = arith.constant 0 : index
    %4 = vector.load %arg3[%c0_2, %c0_3] : memref<32x128xbf16, #tpu.memory_space<vmem>>, vector<32x128xbf16>
    %cst = arith.constant dense<0.000000e+00> : vector<16x128xf32>
    %5 = tpu.matmul %3, %4, %cst {dimension_numbers = #tpu.dot_dimension_numbers<[1], [0], [0], [1], [0, 0, 1, 1], [], []>} : vector<16x32xbf16>, vector<32x128xbf16>, vector<16x128xf32> -> vector<16x128xf32>
    %c0_4 = arith.constant 0 : index
    %c0_5 = arith.constant 0 : index
    %6 = vector.load %arg4[%c0_4, %c0_5] : memref<1x128xf32, #tpu.memory_space<vmem>>, vector<1x128xf32>
    %7 = vector.broadcast %6 : vector<1x128xf32> to vector<16x128xf32>
    %8 = arith.addf %5, %7 : vector<16x128xf32>
    %c0_6 = arith.constant 0 : index
    %c0_7 = arith.constant 0 : index
    %9 = vector.load %arg6[%c0_6, %c0_7] : memref<16x128xf32, #tpu.memory_space<vmem>>, vector<16x128xf32>
    tpu.vector_store %arg6[%c0_6, %c0_7], %8 {strides = array<i32>} : memref<16x128xf32, #tpu.memory_space<vmem>>, vector<16x128xf32>,
    %c0_8 = arith.constant 0 : index
    %c0_9 = arith.constant 0 : index
    %10 = vector.load %arg8[%c0_8, %c0_9] : memref<16x1xf32, #tpu.memory_space<vmem>>, vector<16x1xf32>
    %cst_10 = arith.constant dense<0xFF800000> : vector<16xf32>
    %11 = vector.multi_reduction <maximumf>, %8, %cst_10 [1] : vector<16x128xf32> to vector<16xf32>
    %12 = vector.shape_cast %11 : vector<16xf32> to vector<16x1xf32>
    %13 = arith.maximumf %10, %12 : vector<16x1xf32>
    %14 = arith.subf %10, %13 : vector<16x1xf32>
    %15 = math.exp %14 : vector<16x1xf32>
    %c0_11 = arith.constant 0 : index
    %c0_12 = arith.constant 0 : index
    %16 = vector.load %arg9[%c0_11, %c0_12] : memref<16x1xf32, #tpu.memory_space<vmem>>, vector<16x1xf32>
    %17 = arith.mulf %15, %16 : vector<16x1xf32>
    %18 = vector.broadcast %13 : vector<16x1xf32> to vector<16x128xf32>
    %19 = arith.subf %8, %18 : vector<16x128xf32>
    %20 = math.exp %19 : vector<16x128xf32>
    %cst_13 = arith.constant dense<0.000000e+00> : vector<16xf32>
    %21 = vector.multi_reduction <add>, %20, %cst_13 [1] : vector<16x128xf32> to vector<16xf32>
    %22 = vector.shape_cast %21 : vector<16xf32> to vector<16x1xf32>
    %23 = arith.addf %17, %22 : vector<16x1xf32>
    %c0_14 = arith.constant 0 : index
    %c0_15 = arith.constant 0 : index
    %24 = vector.load %arg9[%c0_14, %c0_15] : memref<16x1xf32, #tpu.memory_space<vmem>>, vector<16x1xf32>
    tpu.vector_store %arg9[%c0_14, %c0_15], %23 {strides = array<i32>} : memref<16x1xf32, #tpu.memory_space<vmem>>, vector<16x1xf32>,
    %c0_16 = arith.constant 0 : index
    %c0_17 = arith.constant 0 : index
    %25 = vector.load %arg8[%c0_16, %c0_17] : memref<16x1xf32, #tpu.memory_space<vmem>>, vector<16x1xf32>
    tpu.vector_store %arg8[%c0_16, %c0_17], %13 {strides = array<i32>} : memref<16x1xf32, #tpu.memory_space<vmem>>, vector<16x1xf32>,
    %c0_18 = arith.constant 0 : index
    %c0_19 = arith.constant 0 : index
    %26 = vector.load %arg5[%c0_18, %c0_19] : memref<16x1xi32, #tpu.memory_space<vmem>>, vector<16x1xi32>
    %c128_i32 = arith.constant 128 : i32
    %27 = arith.muli %arg1, %c128_i32 : i32
    %28 = vector.broadcast %27 : i32 to vector<16x1xi32>
    %29 = arith.subi %26, %28 : vector<16x1xi32>
    %30 = tpu.iota {dimensions = array<i32: 1>} : vector<16x128xi32>
    %c0_20 = arith.constant 0 : index
    %c0_21 = arith.constant 0 : index
    %31 = vector.load %arg10[%c0_20, %c0_21] : memref<16x1xf32, #tpu.memory_space<vmem>>, vector<16x1xf32>
    %32 = vector.broadcast %29 : vector<16x1xi32> to vector<16x128xi32>
    %33 = arith.cmpi eq, %30, %32 : vector<16x128xi32>
    %cst_22 = arith.constant 0.000000e+00 : f32
    %34 = vector.broadcast %cst_22 : f32 to vector<16x128xf32>
    %35 = arith.select %33, %8, %34 : vector<16x128xi1>, vector<16x128xf32>
    %cst_23 = arith.constant dense<0.000000e+00> : vector<16xf32>
    %36 = vector.multi_reduction <add>, %35, %cst_23 [1] : vector<16x128xf32> to vector<16xf32>
    %37 = vector.shape_cast %36 : vector<16xf32> to vector<16x1xf32>
    %38 = arith.addf %31, %37 : vector<16x1xf32>
    %c0_24 = arith.constant 0 : index
    %c0_25 = arith.constant 0 : index
    %39 = vector.load %arg10[%c0_24, %c0_25] : memref<16x1xf32, #tpu.memory_space<vmem>>, vector<16x1xf32>
    tpu.vector_store %arg10[%c0_24, %c0_25], %38 {strides = array<i32>} : memref<16x1xf32, #tpu.memory_space<vmem>>, vector<16x1xf32>,
    %c0_i32_26 = arith.constant 0 : i32
    %40 = arith.cmpi eq, %arg1, %c0_i32_26 : i32
    %41 = arith.extui %40 : i1 to i32
    %c0_i32_27 = arith.constant 0 : i32
    %42 = arith.cmpi ne, %41, %c0_i32_27 : i32
    scf.if %42 {
      %c0_28 = arith.constant 0 : index
      %c0_29 = arith.constant 0 : index
      %43 = vector.load %arg8[%c0_28, %c0_29] : memref<16x1xf32, #tpu.memory_space<vmem>>, vector<16x1xf32>
      %c0_30 = arith.constant 0 : index
      %c0_31 = arith.constant 0 : index
      %44 = vector.load %arg9[%c0_30, %c0_31] : memref<16x1xf32, #tpu.memory_space<vmem>>, vector<16x1xf32>
      %45 = math.log %44 : vector<16x1xf32>
      %46 = arith.addf %43, %45 : vector<16x1xf32>
      %c0_32 = arith.constant 0 : index
      %c0_33 = arith.constant 0 : index
      %47 = vector.load %arg10[%c0_32, %c0_33] : memref<16x1xf32, #tpu.memory_space<vmem>>, vector<16x1xf32>
      %48 = arith.subf %46, %47 : vector<16x1xf32>
      %c0_34 = arith.constant 0 : index
      %c0_35 = arith.constant 0 : index
      %49 = vector.load %arg7[%c0_34, %c0_35] : memref<16x1xf32, #tpu.memory_space<vmem>>, vector<16x1xf32>
      tpu.vector_store %arg7[%c0_34, %c0_35], %48 {strides = array<i32>} : memref<16x1xf32, #tpu.memory_space<vmem>>, vector<16x1xf32>,
    } else {
    }
    return
  }
  func.func @transform_0(%arg0: i32, %arg1: i32) -> (i32, i32) {
    %c0_i32 = arith.constant 0 : i32
    %c0_i32_0 = arith.constant 0 : i32
    return %arg0, %c0_i32 : i32, i32
  }
  func.func @transform_1(%arg0: i32, %arg1: i32) -> (i32, i32) {
    %c0_i32 = arith.constant 0 : i32
    %c0_i32_0 = arith.constant 0 : i32
    return %c0_i32, %arg1 : i32, i32
  }
  func.func @transform_2(%arg0: i32, %arg1: i32) -> (i32, i32) {
    %c0_i32 = arith.constant 0 : i32
    %c0_i32_0 = arith.constant 0 : i32
    return %c0_i32, %arg1 : i32, i32
  }
  func.func @transform_3(%arg0: i32, %arg1: i32) -> (i32, i32) {
    %c0_i32 = arith.constant 0 : i32
    %c0_i32_0 = arith.constant 0 : i32
    return %arg0, %c0_i32 : i32, i32
  }
  func.func @transform_4(%arg0: i32, %arg1: i32) -> (i32, i32) {
    %c0_i32 = arith.constant 0 : i32
    return %arg0, %arg1 : i32, i32
  }
  func.func @transform_5(%arg0: i32, %arg1: i32) -> (i32, i32) {
    %c0_i32 = arith.constant 0 : i32
    %c0_i32_0 = arith.constant 0 : i32
    return %arg0, %c0_i32 : i32, i32
  }
}

</mosaic_0001>

<bundles_post_ra>
// kernel: tpu_custom_call.1
= control target key start
LH: loop header
LB: loop body
LE: loop exit
PB: predicated region body
PF: predicated region fallthrough
CT: control target
= control target key end

     0   :  { %11 = vsyncpa [#allocation6], 0  ;;  %s426_s0 = inlined_call_operand.hbm [shape: bf16[16,32], index: 0, kind: input, shape index: {}]   ;;  %s427_s1 = inlined_call_operand.vmem [shape: bf16[32,128], index: 1, kind: input, shape index: {}]   ;;  %s428_s2 = inlined_call_operand.vmem [shape: f32[1,128], index: 2, kind: input, shape index: {}]   ;;  %s429_s3 = inlined_call_operand.vmem [shape: s32[16,1], index: 3, kind: input, shape index: {}]   ;;  %s430_s4 = inlined_call_operand.hbm [shape: f32[16,128], index: 4, kind: output, shape index: {0}]   ;;  %s431_s5 = inlined_call_operand.vmem [shape: f32[16,1], index: 5, kind: output, shape index: {1}]  }
   0x1   :  { %12 = vsyncpa [#allocation7], 0  ;;  %s327_s18 = smov [#allocation5]   ;;  %s279_s22 = scalar_lea.hbm %s426_s0, 128 }
   0x2   :  { %s18_s19 = sshll.u32 %s327_s18, 4  ;;  %p280_p0 = scmp.ne.s32.totalorder %s426_s0, %s279_s22  ;;  %s19_s19 = int_to_ptr.vmem [resolvable:$true] %s18_s19 }
   0x3   :  { %p283_p1 = scmp.lt.u32.totalorder %s279_s22, %s426_s0 }
   0x5   :  { %p285_p2 = pnand %p283_p1, %p280_p0 }
   0x7   :  { %288 = shalt.err (!%p285_p2)
}
   0x8   :  { %s289_s27 = scalar_lea.vmem %s19_s19, 128  ;;  %p294_p4 = scmp.lt.s32.totalorder %s19_s19, %s19_s19 }
   0x9   :  { %p290_p3 = scmp.ne.s32.totalorder %s19_s19, %s289_s27  ;;  %p295_p5 = scmp.lt.s32.totalorder %s289_s27, %s289_s27 }
   0xb   :  { %p296_p6 = por %p295_p5, %p294_p4 }
   0xd   :  { %p297_p7 = pnand %p296_p6, %p290_p3 }
   0xf   :  { %300 = shalt.err (!%p297_p7)
}
  0x10   :  { %s328_s28 = smov 64   ;;  %s329_s29 = smov 4  }
  0x11   :  { %24 = dma.hbm_to_vmem [thread:$0]  %s426_s0, 128, %s19_s19, [#allocation6], %s328_s28, %s328_s28, %s329_s29  }
  0x12   :  { %323 = dma.done.wait [#allocation6], 128  }
  0x13   :  { %324 = vsyncadd [#allocation6], 4294967168  ;;  %v330_v0 = vmov 0.0   ;;  %vm331_vm0 = vmmov 0   ;;  %v264_v1 = vld [vmem:[%s427_s1] sm:$0xff]   ;;  %v265_v2 = vld [vmem:[%s427_s1 + $0x8] sm:$0xff]   ;;  %v174_v21 = vlaneseq }
  0x14   :  { %244 = vmatprep.subr.bf16.mxu0 %v330_v0  ;;  %248 = vmatprep.mubr.msk.bf16.mxu0 %vm331_vm0, %v330_v0  ;;  %v266_v3 = vld [vmem:[#allocation5] sm:$0xff]   ;;  %vm76_vm1 = vcmask 261120   ;;  %v332_v4 = vmov 0   ;;  %vm39_vm2 = vcmask 7168   ;;  %v333_v5 = vmov -inf   ;;  %v168_v13 = vld [vmem:[%s429_s3] sm:$0xff] }
  0x15   :  { %245 = vmatpush3.bf16.msra.mxu0 %v264_v1  ;;  %263 = vset.pattern.permute.xlu0 %v332_v4  ;;  %40 = vst.msk [vmem:[#allocation2] sm:$0xff] %vm39_vm2, %v333_v5  ;;  %41 = vst.msk [vmem:[#allocation2 + $0x8] sm:$0xff] %vm39_vm2, %v333_v5  ;;  %v236_v6 = vld [vmem:[%s428_s2] ss:$0 sm:$0xff]  ;;  %v169_v23 = vld [vmem:[%s429_s3 + $0x8] sm:$0xff]  ;;  %v175_v24 = vand.u32 127, %v174_v21 }
  0x16   :  { %246 = vmatprep.subr.bf16.mxu0 %v330_v0  ;;  %262 = vset.pattern.permute.xlu1 %v332_v4  ;;  %42 = vst.msk [vmem:[#allocation3] sm:$0xff] %vm39_vm2, %v330_v0  ;;  %43 = vst.msk [vmem:[#allocation3 + $0x8] sm:$0xff] %vm39_vm2, %v330_v0  ;;  %s334_s3 = smov [#allocation8]  }
  0x17   :  { %44 = vst.msk [vmem:[#allocation4] sm:$0xff] %vm39_vm2, %v330_v0  ;;  %45 = vst.msk [vmem:[#allocation4 + $0x8] sm:$0xff] %vm39_vm2, %v330_v0  ;;  %s220_s14 = sshll.u32 %s334_s3, 4  ;;  %s221_s14 = int_to_ptr.vmem [resolvable:$true] %s220_s14 }
  0x18   :  { %s301_s15 = scalar_lea.vmem %s221_s14, 256  ;;  %p306_p9 = scmp.lt.s32.totalorder %s221_s14, %s221_s14 }
  0x19   :  { %247 = vmatpush3.bf16.msra.mxu0 %v265_v2  ;;  %p302_p8 = scmp.ne.s32.totalorder %s221_s14, %s301_s15  ;;  %p307_p10 = scmp.lt.s32.totalorder %s301_s15, %s301_s15 }
  0x1b   :  { %p308_p11 = por %p307_p10, %p306_p9 }
  0x1c   :  { %249 = vmatmul.mubr.msk.bf16.vlgmr.msra.gmra.mrb[0].mxu0 %vm76_vm1, %v266_v3  ;;  %v123_v14 = vld [vmem:[#allocation2] sm:$0xff]  ;;  %v124_v17 = vld [vmem:[#allocation2 + $0x8] sm:$0xff] }
  0x1d   :  { %p309_p12 = pnand %p308_p11, %p302_p8 }
  0x1e   :  { %v176_v37 = vld [vmem:[#allocation4] sm:$0xff] }
  0xef   :  { %v114_v7 = vpop.f32.mrb[0].mxu0 }
  0xf0   :  { %v115_v8 = vadd.f32 %v236_v6, %v114_v7  ;;  %v250_v9 = vpop.f32.mrb[1].mxu0 }
  0xf1   :  { %v117_v10 = vpop.f32.mrb[2].mxu0 }
  0xf2   :  { %121 = vst [vmem:[#allocation8] sm:$0xff] %v115_v8  ;;  %v118_v11 = vadd.f32 %v236_v6, %v117_v10  ;;  %125 = vmax.xlane.f32.xlu0 %v115_v8  ;;  %v251_v12 = vpop.f32.mrb[3].mxu0 }
  0xf4   :  { %122 = vst [vmem:[#allocation8 + $0x8] sm:$0xff] %v118_v11 }
  0xf6   :  { %127 = vmax.xlane.f32.xlu0 %v118_v11 }
 0x10c   :  { %179 = vperm.xlu0 %263, %v168_v13  }
 0x17f   :  { %v126_v15 = vpop.xlane.xlu0 %125 }
 0x180   :  { %v129_v16 = vmax.f32 %v123_v14, %v126_v15 }
 0x182   :  { %v131_v18 = vsub.f32 %v123_v14, %v129_v16  ;;  %166 = vst.msk [vmem:[#allocation2] sm:$0xff] %vm39_vm2, %v129_v16  ;;  %143 = vperm.xlu1 %262, %v129_v16  }
 0x183   :  { %v128_v19 = vpop.xlane.xlu0 %127 }
 0x184   :  { %v130_v20 = vmax.f32 %v124_v17, %v128_v19 }
 0x186   :  { %v132_v22 = vsub.f32 %v124_v17, %v130_v20  ;;  %167 = vst.msk [vmem:[#allocation2 + $0x8] sm:$0xff] %vm39_vm2, %v130_v20  ;;  %148 = vperm.xlu1 %262, %v130_v20  }
 0x18a   :  { %182 = vperm.xlu1 %262, %v169_v23  }
 0x18b   :  { %v180_v25 = vpop.permute.xlu0 %179 }
 0x18c   :  { %vm184_vm3 = vcmp.eq.s32.totalorder %v175_v24, %v180_v25 }
 0x18d   :  { %v186_v26 = vsel %vm184_vm3, %v115_v8, 0.0 }
 0x18e   :  { %188 = vadd.xlane.f32.xlu0 %v186_v26 }
 0x201   :  { %v144_v27 = vpop.permute.xlu1 %143 }
 0x202   :  { %v151_v28 = vsub.f32 %v115_v8, %v144_v27 }
 0x204   :  { %v153_v29 = vmul.f32 1.442695, %v151_v28 }
 0x205   :  { %v149_v30 = vpop.permute.xlu1 %148 }
 0x206   :  { %267 = vpow2.f32 %v153_v29  ;;  %v152_v31 = vsub.f32 %v118_v11, %v149_v30 }
 0x208   :  { %v155_v32 = vmul.f32 1.442695, %v152_v31 }
 0x209   :  { %v183_v34 = vpop.permute.xlu1 %182 }
 0x20a   :  { %269 = vpow2.f32 %v155_v32  ;;  %vm185_vm4 = vcmp.eq.s32.totalorder %v175_v24, %v183_v34 }
 0x20b   :  { %v187_v36 = vsel %vm185_vm4, %v118_v11, 0.0 }
 0x210   :  { %v268_v33 = vpop.eup %267 }
 0x211   :  { %157 = vadd.xlane.f32.xlu1 %v268_v33 }
 0x214   :  { %v270_v35 = vpop.eup %269 }
 0x215   :  { %159 = vadd.xlane.f32.xlu1 %v270_v35 }
 0x219   :  { %190 = vadd.xlane.f32.xlu1 %v187_v36 }
 0x21b   :  { %v189_v38 = vpop.xlane.xlu0 %188 }
 0x21c   :  { %v192_v39 = vadd.f32 %v189_v38, %v176_v37 }
 0x21e   :  { %194 = vst.msk [vmem:[#allocation4] sm:$0xff] %vm39_vm2, %v192_v39 }
 0x21f   :  { %312 = shalt.err (!%p309_p12)
}
 0x220   :  { %s313_s18 = scalar_lea.hbm %s430_s4, 256 }
 0x221   :  { %p314_p13 = scmp.ne.s32.totalorder %s430_s4, %s313_s18  ;;  %p317_p0 = scmp.lt.u32.totalorder %s313_s18, %s430_s4 }
 0x223   :  { %p319_p1 = pnand %p317_p0, %p314_p13 }
 0x225   :  { %322 = shalt.err (!%p319_p1)
}
 0x226   :  { %s335_s23 = smov 128   ;;  %s336_s24 = smov 8   ;;  %v133_v40 = vmul.f32 1.442695, %v131_v18  ;;  %v135_v41 = vmul.f32 1.442695, %v132_v22 }
 0x227   :  { %226 = dma.vmem_to_hbm [thread:$0]  %s221_s14, 256, %s430_s4, [#allocation7], %s335_s23, %s335_s23, %s336_s24   ;;  %v137_v43 = vld [vmem:[#allocation3] sm:$0xff]  ;;  %v138_v47 = vld [vmem:[#allocation3 + $0x8] sm:$0xff]  ;;  %v177_v52 = vld [vmem:[#allocation4 + $0x8] sm:$0xff] }
 0x228   :  { %271 = vpow2.f32 %v133_v40  ;;  %v199_v59 = vld [vmem:[#allocation2] sm:$0xff]  ;;  %v200_v1 = vld [vmem:[#allocation2 + $0x8] sm:$0xff] }
 0x229   :  { %273 = vpow2.f32 %v135_v41  ;;  %v209_v62 = vld [vmem:[#allocation4] sm:$0xff] }
 0x232   :  { %v272_v42 = vpop.eup %271 }
 0x233   :  { %v139_v44 = vmul.f32 %v272_v42, %v137_v43  ;;  %v274_v45 = vpop.eup %273 }
 0x234   :  { %v140_v49 = vmul.f32 %v274_v45, %v138_v47 }
 0x29e   :  { %v158_v46 = vpop.xlane.xlu1 %157 }
 0x29f   :  { %v161_v48 = vadd.f32 %v158_v46, %v139_v44 }
 0x2a1   :  { %164 = vst.msk [vmem:[#allocation3] sm:$0xff] %vm39_vm2, %v161_v48 }
 0x2a2   :  { %v160_v50 = vpop.xlane.xlu1 %159 }
 0x2a3   :  { %v162_v51 = vadd.f32 %v160_v50, %v140_v49 }
 0x2a5   :  { %165 = vst.msk [vmem:[#allocation3 + $0x8] sm:$0xff] %vm39_vm2, %v162_v51 }
 0x2a6   :  { %v191_v53 = vpop.xlane.xlu1 %190 }
 0x2a7   :  { %v193_v54 = vadd.f32 %v191_v53, %v177_v52 }
 0x2a8   :  { %v201_v55 = vld [vmem:[#allocation3] sm:$0xff] }
 0x2a9   :  { %275 = vlog2.f32 %v201_v55  ;;  %195 = vst.msk [vmem:[#allocation4 + $0x8] sm:$0xff] %vm39_vm2, %v193_v54 }
 0x2ac   :  { %v202_v56 = vld [vmem:[#allocation3 + $0x8] sm:$0xff] }
 0x2ad   :  { %277 = vlog2.f32 %v202_v56 }
 0x2b0   :  { %v210_v3 = vld [vmem:[#allocation4 + $0x8] sm:$0xff] }
 0x2b3   :  { %v276_v57 = vpop.eup %275 }
 0x2b4   :  { %v204_v58 = vmul.f32 0.6931472, %v276_v57 }
 0x2b6   :  { %v207_v60 = vadd.f32 %v204_v58, %v199_v59 }
 0x2b7   :  { %v278_v61 = vpop.eup %277 }
 0x2b8   :  { %v211_v63 = vsub.f32 %v207_v60, %v209_v62  ;;  %v206_v0 = vmul.f32 0.6931472, %v278_v61 }
 0x2ba   :  { %213 = vst.msk [vmem:[%s431_s5] sm:$0xff] %vm39_vm2, %v211_v63  ;;  %v208_v2 = vadd.f32 %v206_v0, %v200_v1 }
 0x2bc   :  { %v212_v4 = vsub.f32 %v208_v2, %v210_v3 }
 0x2be   :  { %214 = vst.msk [vmem:[%s431_s5 + $0x8] sm:$0xff] %vm39_vm2, %v212_v4 }
 0x2bf   :  { %325 = dma.done.wait [#allocation7], 256  }
 0x2c0   :  { %326 = vsyncadd [#allocation7], 4294967040 }
 0x2c1   :  { %234 = vsyncpa [#allocation6], 1 }
 0x2c2   :  { %235 = vsyncpa [#allocation7], 1 }

</bundles_post_ra>
